<compile_context>
chip_gen: v5e
topology: v5e:2x2
jax: 0.10.0
libtpu: 0.0.40
codegen_flags: <defaults>
</compile_context>

<pallas_src>
import functools

import jax
import jax.numpy as jnp
from jax.experimental import pallas as pl
from jax.experimental.pallas import tpu as pltpu


def _round_up(v, m):
    return ((v + m - 1) // m) * m


def _vae_fc2_kernel(
    x_ref, eps_ref,
    w1_ref, b1_ref, w2_ref, b2_ref,
    wmulv_ref, bmulv_ref,
    w3_ref, b3_ref, w4_ref, b4_ref, w5_ref, b5_ref,
    stats_out, dec_out,
    *, latent,
):
    """Fused VAE forward: encoder -> (mu|log_var) -> reparameterize -> decoder.

    Weights arrive in bf16; activations are cast to bf16 at each dot input
    (MXU fast path) while accumulation and all elementwise work stay in f32.
    stats_out = [encoded | mu | log_var | zero-pad] as one 128-lane-multiple slab.
    """
    f32 = jnp.float32
    bf16 = jnp.bfloat16

    x = x_ref[...]

    # --- encoder ---
    h1 = jnp.dot(x.astype(bf16), w1_ref[...], preferred_element_type=f32) + b1_ref[...]
    h1 = jnp.maximum(h1, 0.0)
    enc = jnp.dot(h1.astype(bf16), w2_ref[...], preferred_element_type=f32) + b2_ref[...]
    enc = jnp.maximum(enc, 0.0)

    # --- fused latent heads: [mu | log_var | 0-pad], one lane-padded matmul ---
    mulv = (jnp.dot(enc.astype(bf16), wmulv_ref[...], preferred_element_type=f32)
            + bmulv_ref[...])
    mu = mulv[:, :latent]
    lv = mulv[:, latent:2 * latent]

    # --- reparameterize: z = mu + eps * exp(0.5 * log_var)  (f32 VPU/EUP) ---
    z = mu + eps_ref[...] * jnp.exp(0.5 * lv)

    # --- decoder ---
    d1 = jnp.dot(z.astype(bf16), w3_ref[...], preferred_element_type=f32) + b3_ref[...]
    d1 = jnp.maximum(d1, 0.0)
    d2 = jnp.dot(d1.astype(bf16), w4_ref[...], preferred_element_type=f32) + b4_ref[...]
    d2 = jnp.maximum(d2, 0.0)
    logits = jnp.dot(d2.astype(bf16), w5_ref[...], preferred_element_type=f32) + b5_ref[...]

    # --- lane-dense (128-multiple) outputs: unmasked full-width stores ---
    stats_out[...] = jnp.concatenate([enc, mulv], axis=-1)
    dec_out[...] = jax.nn.sigmoid(logits)


def prepare_params(params, img_size):
    """One-time host-side param prep (hoisted out of the per-call path):
      * fuse the mu / log_var heads into one GEMM,
      * zero-pad the fused head and w5/b5 so kernel outputs are 128-lane dense,
      * cast all matmul weights to bf16 (biases stay f32: added to f32 accum).
    """
    inter2 = params["w2"].shape[1]
    latent = params["wmu"].shape[1]

    stats_pad = _round_up(inter2 + 2 * latent, 128)   # width of stats slab
    head_pad = stats_pad - inter2                     # padded fused-head width
    dec_pad = _round_up(img_size, 128)                # padded decoder width

    w_mulv = jnp.concatenate([params["wmu"], params["wlv"]], axis=1)
    b_mulv = jnp.concatenate([params["bmu"], params["blv"]], axis=1)
    w_mulv = jnp.pad(w_mulv, ((0, 0), (0, head_pad - 2 * latent)))
    b_mulv = jnp.pad(b_mulv, ((0, 0), (0, head_pad - 2 * latent)))

    w5 = jnp.pad(params["w5"], ((0, 0), (0, dec_pad - img_size)))
    b5 = jnp.pad(params["b5"], ((0, 0), (0, dec_pad - img_size)))

    bf16 = jnp.bfloat16
    return {
        "w1": params["w1"].astype(bf16), "b1": params["b1"],
        "w2": params["w2"].astype(bf16), "b2": params["b2"],
        "wmulv": w_mulv.astype(bf16),    "bmulv": b_mulv,
        "w3": params["w3"].astype(bf16), "b3": params["b3"],
        "w4": params["w4"].astype(bf16), "b4": params["b4"],
        "w5": w5.astype(bf16),           "b5": b5,
    }


def _choose_batch_tile(B):
    """8-aligned batch tile: single tile for small batches; otherwise large
    tiles (<=1024 for v7x 32 MiB scoped-VMEM headroom at these widths) split
    into >=2 near-even steps so the parallel axis feeds both v7x TensorCores."""
    if B <= 512:
        return B
    n_steps = max(2, pl.cdiv(B, 1024))
    return min(1024, _round_up(pl.cdiv(B, n_steps), 8))


@jax.jit
def vae_fc2_forward(x_nchw, eps, prepped):
    """Runs the fused VAE_FC2 forward pass.

    x_nchw:  (B, 1, y_size, x_size) float32  (PyTorch NCHW convention)
    eps:     (B, latent_size) float32 standard-normal noise (randn_like(std))
    prepped: output of prepare_params (bf16, fused, lane-padded weights)
    Returns (x_flat, encoded, decoded, mu, log_var) exactly like the module.
    """
    B = x_nchw.shape[0]
    x_flat = x_nchw.reshape(B, -1)           # matches x.view(-1, img_size); free in XLA
    img_size = x_flat.shape[1]

    latent = eps.shape[1]
    inter2 = prepped["w2"].shape[1]
    stats_pad = inter2 + prepped["wmulv"].shape[1]   # 128-multiple by construction
    dec_pad = prepped["w5"].shape[1]                 # 128-multiple by construction

    TB = _choose_batch_tile(B)
    grid = (pl.cdiv(B, TB),)

    def row_spec(cols):
        return pl.BlockSpec((TB, cols), lambda i: (i, 0))

    def const_spec(shape):
        return pl.BlockSpec(shape, lambda i: (0, 0))

    in_specs = [
        row_spec(img_size),                          # x_flat
        row_spec(latent),                            # eps
        const_spec(prepped["w1"].shape),    const_spec(prepped["b1"].shape),
        const_spec(prepped["w2"].shape),    const_spec(prepped["b2"].shape),
        const_spec(prepped["wmulv"].shape), const_spec(prepped["bmulv"].shape),
        const_spec(prepped["w3"].shape),    const_spec(prepped["b3"].shape),
        const_spec(prepped["w4"].shape),    const_spec(prepped["b4"].shape),
        const_spec(prepped["w5"].shape),    const_spec(prepped["b5"].shape),
    ]
    out_specs = (
        row_spec(stats_pad),                         # [encoded | mu | log_var | 0-pad]
        row_spec(dec_pad),                           # decoded (padded lanes)
    )

    stats, decoded_pad = pl.pallas_call(
        functools.partial(_vae_fc2_kernel, latent=latent),
        grid=grid,
        out_shape=(
            jax.ShapeDtypeStruct((B, stats_pad), jnp.float32),
            jax.ShapeDtypeStruct((B, dec_pad), jnp.float32),
        ),
        in_specs=in_specs,
        out_specs=out_specs,
        compiler_params=pltpu.CompilerParams(dimension_semantics=("parallel",)),
    )(
        x_flat, eps,
        prepped["w1"], prepped["b1"], prepped["w2"], prepped["b2"],
        prepped["wmulv"], prepped["bmulv"],
        prepped["w3"], prepped["b3"], prepped["w4"], prepped["b4"],
        prepped["w5"], prepped["b5"],
    )

    encoded = stats[:, :inter2]
    mu = stats[:, inter2:inter2 + latent]
    log_var = stats[:, inter2 + latent:inter2 + 2 * latent]
    decoded = decoded_pad[:, :img_size]              # drop sigmoid(0)=0.5 pad lanes
    return x_flat, encoded, decoded, mu, log_var


def init_params(key, img_size, inter1, inter2, latent):
    """Deterministic synthetic parameters (shapes match the nn.Linear layers)."""
    def linear(k, fan_in, fan_out):
        kw, kb = jax.random.split(k)
        lim = 1.0 / jnp.sqrt(fan_in)
        w = jax.random.uniform(kw, (fan_in, fan_out), jnp.float32, -lim, lim)
        b = jax.random.uniform(kb, (1, fan_out), jnp.float32, -lim, lim)
        return w, b

    keys = jax.random.split(key, 7)
    p = {}
    p["w1"], p["b1"] = linear(keys[0], img_size, inter1)   # encoder.0
    p["w2"], p["b2"] = linear(keys[1], inter1, inter2)     # encoder.2
    p["wmu"], p["bmu"] = linear(keys[2], inter2, latent)   # mu
    p["wlv"], p["blv"] = linear(keys[3], inter2, latent)   # log_var
    p["w3"], p["b3"] = linear(keys[4], latent, inter2)     # decoder.0
    p["w4"], p["b4"] = linear(keys[5], inter2, inter1)     # decoder.2
    p["w5"], p["b5"] = linear(keys[6], inter1, img_size)   # decoder.4
    return p


if __name__ == "__main__":
    # Small shapes consistent with the module (img_size divisible by 4 and 20).
    y_size, x_size = 20, 16
    img_size = y_size * x_size          # 320
    inter1 = img_size // 4              # 80
    inter2 = img_size // 20             # 16
    latent_size = 8
    batch = 4

    key = jax.random.PRNGKey(0)
    k_x, k_eps, k_p = jax.random.split(key, 3)

    x = jax.random.normal(k_x, (batch, 1, y_size, x_size), jnp.float32)  # NCHW
    eps = jax.random.normal(k_eps, (batch, latent_size), jnp.float32)
    params = init_params(k_p, img_size, inter1, inter2, latent_size)
    prepped = prepare_params(params, img_size)      # one-time host-side prep

    x_flat, encoded, decoded, mu, log_var = jax.block_until_ready(
        vae_fc2_forward(x, eps, prepped)
    )

    # Pure-JAX f32 reference of the same math (original, un-quantized params).
    def ref(xf):
        h1 = jnp.maximum(xf @ params["w1"] + params["b1"], 0.0)
        enc = jnp.maximum(h1 @ params["w2"] + params["b2"], 0.0)
        m = enc @ params["wmu"] + params["bmu"]
        lv = enc @ params["wlv"] + params["blv"]
        z = m + eps * jnp.exp(0.5 * lv)
        d1 = jnp.maximum(z @ params["w3"] + params["b3"], 0.0)
        d2 = jnp.maximum(d1 @ params["w4"] + params["b4"], 0.0)
        dec = jax.nn.sigmoid(d2 @ params["w5"] + params["b5"])
        return enc, dec, m, lv

    xf_ref = x.reshape(batch, img_size)
    enc_r, dec_r, mu_r, lv_r = ref(xf_ref)

    # bf16 matmul inputs => loosened tolerances vs. the f32 reference.
    assert jnp.allclose(x_flat, xf_ref, atol=1e-5)
    assert jnp.allclose(encoded, enc_r, atol=2e-2, rtol=2e-2)
    assert jnp.allclose(decoded, dec_r, atol=2e-2, rtol=2e-2)
    assert jnp.allclose(mu, mu_r, atol=2e-2, rtol=2e-2)
    assert jnp.allclose(log_var, lv_r, atol=2e-2, rtol=2e-2)
    assert decoded.shape == (batch, img_size)

    print("KERNEL_OK")
</pallas_src>

<mosaic_0001>
module attributes {stable_mosaic.version = 11 : i64} {
  func.func @_vae_fc2_kernel(%arg0: i32, %arg1: memref<4x320xf32, #tpu.memory_space<vmem>>, %arg2: memref<4x8xf32, #tpu.memory_space<vmem>>, %arg3: memref<320x80xbf16, #tpu.memory_space<vmem>>, %arg4: memref<1x80xf32, #tpu.memory_space<vmem>>, %arg5: memref<80x16xbf16, #tpu.memory_space<vmem>>, %arg6: memref<1x16xf32, #tpu.memory_space<vmem>>, %arg7: memref<16x112xbf16, #tpu.memory_space<vmem>>, %arg8: memref<1x112xf32, #tpu.memory_space<vmem>>, %arg9: memref<8x16xbf16, #tpu.memory_space<vmem>>, %arg10: memref<1x16xf32, #tpu.memory_space<vmem>>, %arg11: memref<16x80xbf16, #tpu.memory_space<vmem>>, %arg12: memref<1x80xf32, #tpu.memory_space<vmem>>, %arg13: memref<80x384xbf16, #tpu.memory_space<vmem>>, %arg14: memref<1x384xf32, #tpu.memory_space<vmem>>, %arg15: memref<4x128xf32, #tpu.memory_space<vmem>>, %arg16: memref<4x384xf32, #tpu.memory_space<vmem>>) attributes {dimension_semantics = [#tpu.dimension_semantics<parallel>], iteration_bounds = array<i64: 1>, scalar_prefetch = 0 : i64, scratch_operands = 0 : i64, tpu.core_type = #tpu.core_type<tc>, window_params = [{transform_indices = @transform_0, window_bounds = array<i64: 4, 320>}, {transform_indices = @transform_1, window_bounds = array<i64: 4, 8>}, {pipeline_mode = #tpu.pipeline_mode<synchronous>, transform_indices = @transform_2, window_bounds = array<i64: 320, 80>}, {pipeline_mode = #tpu.pipeline_mode<synchronous>, transform_indices = @transform_3, window_bounds = array<i64: 1, 80>}, {pipeline_mode = #tpu.pipeline_mode<synchronous>, transform_indices = @transform_4, window_bounds = array<i64: 80, 16>}, {pipeline_mode = #tpu.pipeline_mode<synchronous>, transform_indices = @transform_5, window_bounds = array<i64: 1, 16>}, {pipeline_mode = #tpu.pipeline_mode<synchronous>, transform_indices = @transform_6, window_bounds = array<i64: 16, 112>}, {pipeline_mode = #tpu.pipeline_mode<synchronous>, transform_indices = @transform_7, window_bounds = array<i64: 1, 112>}, {pipeline_mode = #tpu.pipeline_mode<synchronous>, transform_indices = @transform_8, window_bounds = array<i64: 8, 16>}, {pipeline_mode = #tpu.pipeline_mode<synchronous>, transform_indices = @transform_9, window_bounds = array<i64: 1, 16>}, {pipeline_mode = #tpu.pipeline_mode<synchronous>, transform_indices = @transform_10, window_bounds = array<i64: 16, 80>}, {pipeline_mode = #tpu.pipeline_mode<synchronous>, transform_indices = @transform_11, window_bounds = array<i64: 1, 80>}, {pipeline_mode = #tpu.pipeline_mode<synchronous>, transform_indices = @transform_12, window_bounds = array<i64: 80, 384>}, {pipeline_mode = #tpu.pipeline_mode<synchronous>, transform_indices = @transform_13, window_bounds = array<i64: 1, 384>}, {transform_indices = @transform_14, window_bounds = array<i64: 4, 128>}, {transform_indices = @transform_15, window_bounds = array<i64: 4, 384>}]} {
    %c0 = arith.constant 0 : index
    %c0_0 = arith.constant 0 : index
    %0 = vector.load %arg1[%c0, %c0_0] : memref<4x320xf32, #tpu.memory_space<vmem>>, vector<4x320xf32>
    %1 = arith.truncf %0 : vector<4x320xf32> to vector<4x320xbf16>
    %c0_1 = arith.constant 0 : index
    %c0_2 = arith.constant 0 : index
    %2 = vector.load %arg3[%c0_1, %c0_2] : memref<320x80xbf16, #tpu.memory_space<vmem>>, vector<320x80xbf16>
    %cst = arith.constant dense<0.000000e+00> : vector<4x80xf32>
    %3 = tpu.matmul %1, %2, %cst {dimension_numbers = #tpu.dot_dimension_numbers<[1], [0], [0], [1], [0, 0, 1, 1], [], []>} : vector<4x320xbf16>, vector<320x80xbf16>, vector<4x80xf32> -> vector<4x80xf32>
    %c0_3 = arith.constant 0 : index
    %c0_4 = arith.constant 0 : index
    %4 = vector.load %arg4[%c0_3, %c0_4] : memref<1x80xf32, #tpu.memory_space<vmem>>, vector<1x80xf32>
    %5 = vector.broadcast %4 : vector<1x80xf32> to vector<4x80xf32>
    %6 = arith.addf %3, %5 : vector<4x80xf32>
    %cst_5 = arith.constant 0.000000e+00 : f32
    %7 = vector.broadcast %cst_5 : f32 to vector<4x80xf32>
    %8 = arith.maximumf %6, %7 : vector<4x80xf32>
    %9 = arith.truncf %8 : vector<4x80xf32> to vector<4x80xbf16>
    %c0_6 = arith.constant 0 : index
    %c0_7 = arith.constant 0 : index
    %10 = vector.load %arg5[%c0_6, %c0_7] : memref<80x16xbf16, #tpu.memory_space<vmem>>, vector<80x16xbf16>
    %cst_8 = arith.constant dense<0.000000e+00> : vector<4x16xf32>
    %11 = tpu.matmul %9, %10, %cst_8 {dimension_numbers = #tpu.dot_dimension_numbers<[1], [0], [0], [1], [0, 0, 1, 1], [], []>} : vector<4x80xbf16>, vector<80x16xbf16>, vector<4x16xf32> -> vector<4x16xf32>
    %c0_9 = arith.constant 0 : index
    %c0_10 = arith.constant 0 : index
    %12 = vector.load %arg6[%c0_9, %c0_10] : memref<1x16xf32, #tpu.memory_space<vmem>>, vector<1x16xf32>
    %13 = vector.broadcast %12 : vector<1x16xf32> to vector<4x16xf32>
    %14 = arith.addf %11, %13 : vector<4x16xf32>
    %cst_11 = arith.constant 0.000000e+00 : f32
    %15 = vector.broadcast %cst_11 : f32 to vector<4x16xf32>
    %16 = arith.maximumf %14, %15 : vector<4x16xf32>
    %17 = arith.truncf %16 : vector<4x16xf32> to vector<4x16xbf16>
    %c0_12 = arith.constant 0 : index
    %c0_13 = arith.constant 0 : index
    %18 = vector.load %arg7[%c0_12, %c0_13] : memref<16x112xbf16, #tpu.memory_space<vmem>>, vector<16x112xbf16>
    %cst_14 = arith.constant dense<0.000000e+00> : vector<4x112xf32>
    %19 = tpu.matmul %17, %18, %cst_14 {dimension_numbers = #tpu.dot_dimension_numbers<[1], [0], [0], [1], [0, 0, 1, 1], [], []>} : vector<4x16xbf16>, vector<16x112xbf16>, vector<4x112xf32> -> vector<4x112xf32>
    %c0_15 = arith.constant 0 : index
    %c0_16 = arith.constant 0 : index
    %20 = vector.load %arg8[%c0_15, %c0_16] : memref<1x112xf32, #tpu.memory_space<vmem>>, vector<1x112xf32>
    %21 = vector.broadcast %20 : vector<1x112xf32> to vector<4x112xf32>
    %22 = arith.addf %19, %21 : vector<4x112xf32>
    %23 = vector.extract_strided_slice %22 {offsets = [0, 0], sizes = [4, 8], strides = [1, 1]} : vector<4x112xf32> to vector<4x8xf32>
    %24 = vector.extract_strided_slice %22 {offsets = [0, 8], sizes = [4, 8], strides = [1, 1]} : vector<4x112xf32> to vector<4x8xf32>
    %c0_17 = arith.constant 0 : index
    %c0_18 = arith.constant 0 : index
    %25 = vector.load %arg2[%c0_17, %c0_18] : memref<4x8xf32, #tpu.memory_space<vmem>>, vector<4x8xf32>
    %cst_19 = arith.constant 5.000000e-01 : f32
    %26 = vector.broadcast %cst_19 : f32 to vector<4x8xf32>
    %27 = arith.mulf %26, %24 : vector<4x8xf32>
    %28 = math.exp %27 : vector<4x8xf32>
    %29 = arith.mulf %25, %28 : vector<4x8xf32>
    %30 = arith.addf %23, %29 : vector<4x8xf32>
    %31 = arith.truncf %30 : vector<4x8xf32> to vector<4x8xbf16>
    %c0_20 = arith.constant 0 : index
    %c0_21 = arith.constant 0 : index
    %32 = vector.load %arg9[%c0_20, %c0_21] : memref<8x16xbf16, #tpu.memory_space<vmem>>, vector<8x16xbf16>
    %cst_22 = arith.constant dense<0.000000e+00> : vector<4x16xf32>
    %33 = tpu.matmul %31, %32, %cst_22 {dimension_numbers = #tpu.dot_dimension_numbers<[1], [0], [0], [1], [0, 0, 1, 1], [], []>} : vector<4x8xbf16>, vector<8x16xbf16>, vector<4x16xf32> -> vector<4x16xf32>
    %c0_23 = arith.constant 0 : index
    %c0_24 = arith.constant 0 : index
    %34 = vector.load %arg10[%c0_23, %c0_24] : memref<1x16xf32, #tpu.memory_space<vmem>>, vector<1x16xf32>
    %35 = vector.broadcast %34 : vector<1x16xf32> to vector<4x16xf32>
    %36 = arith.addf %33, %35 : vector<4x16xf32>
    %cst_25 = arith.constant 0.000000e+00 : f32
    %37 = vector.broadcast %cst_25 : f32 to vector<4x16xf32>
    %38 = arith.maximumf %36, %37 : vector<4x16xf32>
    %39 = arith.truncf %38 : vector<4x16xf32> to vector<4x16xbf16>
    %c0_26 = arith.constant 0 : index
    %c0_27 = arith.constant 0 : index
    %40 = vector.load %arg11[%c0_26, %c0_27] : memref<16x80xbf16, #tpu.memory_space<vmem>>, vector<16x80xbf16>
    %cst_28 = arith.constant dense<0.000000e+00> : vector<4x80xf32>
    %41 = tpu.matmul %39, %40, %cst_28 {dimension_numbers = #tpu.dot_dimension_numbers<[1], [0], [0], [1], [0, 0, 1, 1], [], []>} : vector<4x16xbf16>, vector<16x80xbf16>, vector<4x80xf32> -> vector<4x80xf32>
    %c0_29 = arith.constant 0 : index
    %c0_30 = arith.constant 0 : index
    %42 = vector.load %arg12[%c0_29, %c0_30] : memref<1x80xf32, #tpu.memory_space<vmem>>, vector<1x80xf32>
    %43 = vector.broadcast %42 : vector<1x80xf32> to vector<4x80xf32>
    %44 = arith.addf %41, %43 : vector<4x80xf32>
    %cst_31 = arith.constant 0.000000e+00 : f32
    %45 = vector.broadcast %cst_31 : f32 to vector<4x80xf32>
    %46 = arith.maximumf %44, %45 : vector<4x80xf32>
    %47 = arith.truncf %46 : vector<4x80xf32> to vector<4x80xbf16>
    %c0_32 = arith.constant 0 : index
    %c0_33 = arith.constant 0 : index
    %48 = vector.load %arg13[%c0_32, %c0_33] : memref<80x384xbf16, #tpu.memory_space<vmem>>, vector<80x384xbf16>
    %cst_34 = arith.constant dense<0.000000e+00> : vector<4x384xf32>
    %49 = tpu.matmul %47, %48, %cst_34 {dimension_numbers = #tpu.dot_dimension_numbers<[1], [0], [0], [1], [0, 0, 1, 1], [], []>} : vector<4x80xbf16>, vector<80x384xbf16>, vector<4x384xf32> -> vector<4x384xf32>
    %c0_35 = arith.constant 0 : index
    %c0_36 = arith.constant 0 : index
    %50 = vector.load %arg14[%c0_35, %c0_36] : memref<1x384xf32, #tpu.memory_space<vmem>>, vector<1x384xf32>
    %51 = vector.broadcast %50 : vector<1x384xf32> to vector<4x384xf32>
    %52 = arith.addf %49, %51 : vector<4x384xf32>
    %53 = tpu.concatenate %16, %22 in 1 : vector<4x16xf32>, vector<4x112xf32> -> vector<4x128xf32>
    %c0_37 = arith.constant 0 : index
    %c0_38 = arith.constant 0 : index
    %54 = vector.load %arg15[%c0_37, %c0_38] : memref<4x128xf32, #tpu.memory_space<vmem>>, vector<4x128xf32>
    tpu.vector_store %arg15[%c0_37, %c0_38], %53 {strides = array<i32>} : memref<4x128xf32, #tpu.memory_space<vmem>>, vector<4x128xf32>,
    %55 = arith.negf %52 : vector<4x384xf32>
    %56 = math.exp %55 : vector<4x384xf32>
    %cst_39 = arith.constant 1.000000e+00 : f32
    %57 = vector.broadcast %cst_39 : f32 to vector<4x384xf32>
    %58 = arith.addf %57, %56 : vector<4x384xf32>
    %59 = arith.divf %57, %58 : vector<4x384xf32>
    %c0_40 = arith.constant 0 : index
    %c0_41 = arith.constant 0 : index
    %60 = vector.load %arg16[%c0_40, %c0_41] : memref<4x384xf32, #tpu.memory_space<vmem>>, vector<4x384xf32>
    tpu.vector_store %arg16[%c0_40, %c0_41], %59 {strides = array<i32>} : memref<4x384xf32, #tpu.memory_space<vmem>>, vector<4x384xf32>,
    return
  }
  func.func @transform_0(%arg0: i32) -> (i32, i32) {
    %c0_i32 = arith.constant 0 : i32
    %c0_i32_0 = arith.constant 0 : i32
    return %arg0, %c0_i32 : i32, i32
  }
  func.func @transform_1(%arg0: i32) -> (i32, i32) {
    %c0_i32 = arith.constant 0 : i32
    %c0_i32_0 = arith.constant 0 : i32
    return %arg0, %c0_i32 : i32, i32
  }
  func.func @transform_2(%arg0: i32) -> (i32, i32) {
    %c0_i32 = arith.constant 0 : i32
    %c0_i32_0 = arith.constant 0 : i32
    %c0_i32_1 = arith.constant 0 : i32
    return %c0_i32, %c0_i32_0 : i32, i32
  }
  func.func @transform_3(%arg0: i32) -> (i32, i32) {
    %c0_i32 = arith.constant 0 : i32
    %c0_i32_0 = arith.constant 0 : i32
    %c0_i32_1 = arith.constant 0 : i32
    return %c0_i32, %c0_i32_0 : i32, i32
  }
  func.func @transform_4(%arg0: i32) -> (i32, i32) {
    %c0_i32 = arith.constant 0 : i32
    %c0_i32_0 = arith.constant 0 : i32
    %c0_i32_1 = arith.constant 0 : i32
    return %c0_i32, %c0_i32_0 : i32, i32
  }
  func.func @transform_5(%arg0: i32) -> (i32, i32) {
    %c0_i32 = arith.constant 0 : i32
    %c0_i32_0 = arith.constant 0 : i32
    %c0_i32_1 = arith.constant 0 : i32
    return %c0_i32, %c0_i32_0 : i32, i32
  }
  func.func @transform_6(%arg0: i32) -> (i32, i32) {
    %c0_i32 = arith.constant 0 : i32
    %c0_i32_0 = arith.constant 0 : i32
    %c0_i32_1 = arith.constant 0 : i32
    return %c0_i32, %c0_i32_0 : i32, i32
  }
  func.func @transform_7(%arg0: i32) -> (i32, i32) {
    %c0_i32 = arith.constant 0 : i32
    %c0_i32_0 = arith.constant 0 : i32
    %c0_i32_1 = arith.constant 0 : i32
    return %c0_i32, %c0_i32_0 : i32, i32
  }
  func.func @transform_8(%arg0: i32) -> (i32, i32) {
    %c0_i32 = arith.constant 0 : i32
    %c0_i32_0 = arith.constant 0 : i32
    %c0_i32_1 = arith.constant 0 : i32
    return %c0_i32, %c0_i32_0 : i32, i32
  }
  func.func @transform_9(%arg0: i32) -> (i32, i32) {
    %c0_i32 = arith.constant 0 : i32
    %c0_i32_0 = arith.constant 0 : i32
    %c0_i32_1 = arith.constant 0 : i32
    return %c0_i32, %c0_i32_0 : i32, i32
  }
  func.func @transform_10(%arg0: i32) -> (i32, i32) {
    %c0_i32 = arith.constant 0 : i32
    %c0_i32_0 = arith.constant 0 : i32
    %c0_i32_1 = arith.constant 0 : i32
    return %c0_i32, %c0_i32_0 : i32, i32
  }
  func.func @transform_11(%arg0: i32) -> (i32, i32) {
    %c0_i32 = arith.constant 0 : i32
    %c0_i32_0 = arith.constant 0 : i32
    %c0_i32_1 = arith.constant 0 : i32
    return %c0_i32, %c0_i32_0 : i32, i32
  }
  func.func @transform_12(%arg0: i32) -> (i32, i32) {
    %c0_i32 = arith.constant 0 : i32
    %c0_i32_0 = arith.constant 0 : i32
    %c0_i32_1 = arith.constant 0 : i32
    return %c0_i32, %c0_i32_0 : i32, i32
  }
  func.func @transform_13(%arg0: i32) -> (i32, i32) {
    %c0_i32 = arith.constant 0 : i32
    %c0_i32_0 = arith.constant 0 : i32
    %c0_i32_1 = arith.constant 0 : i32
    return %c0_i32, %c0_i32_0 : i32, i32
  }
  func.func @transform_14(%arg0: i32) -> (i32, i32) {
    %c0_i32 = arith.constant 0 : i32
    %c0_i32_0 = arith.constant 0 : i32
    return %arg0, %c0_i32 : i32, i32
  }
  func.func @transform_15(%arg0: i32) -> (i32, i32) {
    %c0_i32 = arith.constant 0 : i32
    %c0_i32_0 = arith.constant 0 : i32
    return %arg0, %c0_i32 : i32, i32
  }
}

</mosaic_0001>

<bundles_post_ra>
// kernel: vae_fc2_forward.1
= control target key start
LH: loop header
LB: loop body
LE: loop exit
PB: predicated region body
PF: predicated region fallthrough
CT: control target
= control target key end

     0   :  { %s1251_s0 = inlined_call_operand.vmem [shape: f32[4,320], index: 0, kind: input, shape index: {}]   ;;  %s1252_s1 = inlined_call_operand.vmem [shape: f32[4,8], index: 1, kind: input, shape index: {}]   ;;  %s1253_s2 = inlined_call_operand.vmem [shape: bf16[320,80], index: 2, kind: input, shape index: {}]   ;;  %s1254_s3 = inlined_call_operand.vmem [shape: f32[1,80], index: 3, kind: input, shape index: {}]   ;;  %s1255_s4 = inlined_call_operand.vmem [shape: bf16[80,16], index: 4, kind: input, shape index: {}]   ;;  %s1256_s5 = inlined_call_operand.vmem [shape: f32[1,16], index: 5, kind: input, shape index: {}]   ;;  %s1257_s6 = inlined_call_operand.vmem [shape: bf16[16,112], index: 6, kind: input, shape index: {}]   ;;  %s1258_s7 = inlined_call_operand.vmem [shape: f32[1,112], index: 7, kind: input, shape index: {}]   ;;  %s1259_s8 = inlined_call_operand.vmem [shape: bf16[8,16], index: 8, kind: input, shape index: {}]   ;;  %s1260_s9 = inlined_call_operand.vmem [shape: f32[1,16], index: 9, kind: input, shape index: {}]   ;;  %s1261_s10 = inlined_call_operand.vmem [shape: bf16[16,80], index: 10, kind: input, shape index: {}]   ;;  %s1262_s11 = inlined_call_operand.vmem [shape: f32[1,80], index: 11, kind: input, shape index: {}]   ;;  %s1263_s12 = inlined_call_operand.vmem [shape: bf16[80,384], index: 12, kind: input, shape index: {}]   ;;  %s1264_s13 = inlined_call_operand.vmem [shape: f32[1,384], index: 13, kind: input, shape index: {}]   ;;  %s1265_s14 = inlined_call_operand.vmem [shape: f32[4,128], index: 14, kind: output, shape index: {0}]   ;;  %s1266_s15 = inlined_call_operand.hbm [shape: f32[4,384], index: 15, kind: output, shape index: {1}]  }
   0x1   :  { %v863_v0 = vld [vmem:[%s1253_s2 + $0x38] sm:$0xff]  ;;  %v862_v3 = vld [vmem:[%s1253_s2 + $0x30] sm:$0xff]  ;;  %v52_v6 = vld [vmem:[%s1251_s0 + $0x8] sm:$0xf] }
   0x2   :  { %v871_v1 = vld [vmem:[%s1253_s2 + $0x78] sm:$0xff]  ;;  %235 = vmatpush.bf16.msra.mxu0 %v863_v0  ;;  %v870_v4 = vld [vmem:[%s1253_s2 + $0x70] sm:$0xff]  ;;  %v861_v7 = vld [vmem:[%s1253_s2 + $0x28] sm:$0xff]  ;;  %57 = vst [vmem:[#allocation1 + $0x10] ss:$2 sm:$0xff] %v52_v6 }
   0x3   :  { %v875_v2 = vld [vmem:[%s1253_s2 + $0x98] sm:$0xff]  ;;  %248 = vmatpush.bf16.msra.mxu1 %v871_v1  ;;  %v874_v5 = vld [vmem:[%s1253_s2 + $0x90] sm:$0xff]  ;;  %v869_v8 = vld [vmem:[%s1253_s2 + $0x68] sm:$0xff] }
   0x4   :  { %265 = vmatpush.bf16.msra.mxu2 %v875_v2  ;;  %v873_v9 = vld [vmem:[%s1253_s2 + $0x88] sm:$0xff]  ;;  %v51_v10 = vld [vmem:[%s1251_s0] sm:$0xff] }
   0x5   :  { %v880_v11 = vld [vmem:[%s1255_s4 + $0x20] sm:$0xff]  ;;  %55 = vst [vmem:[#allocation1] ss:$2 sm:$0xff] %v51_v10 }
   0x6   :  { %236 = vmatpush.bf16.msra.mxu0 %v862_v3  ;;  %327 = vmatpush.bf16.msra.mxu3 %v880_v11 }
   0x7   :  { %249 = vmatpush.bf16.msra.mxu1 %v870_v4 }
   0x8   :  { %266 = vmatpush.bf16.msra.mxu2 %v874_v5 }
   0x9   :  { %21 = vsyncpa [#allocation3], 0  ;;  %v860_v12 = vld [vmem:[%s1253_s2 + $0x20] sm:$0xff]  ;;  %v60_v15 = vld.sshfl [vmem:[#allocation1 + $0x10] sm:$0xff pattern:$0x75316420] }
   0xa   :  { %237 = vmatpush.bf16.msra.mxu0 %v861_v7  ;;  %v868_v13 = vld [vmem:[%s1253_s2 + $0x60] sm:$0xff]  ;;  %v859_v16 = vld [vmem:[%s1253_s2 + $0x18] sm:$0xff]  ;;  %v66_v18 = vpack.c.bf16 %v60_v15, %v60_v15  ;;  %vm231_vm0 = vcmask 523264   ;;  %v858_v19 = vld [vmem:[%s1253_s2 + $0x10] sm:$0xff]  ;;  %vm320_vm1 = vcmask 654336   ;;  %vm351_vm2 = vcmask 130048  }
   0xb   :  { %250 = vmatpush.bf16.msra.mxu1 %v869_v8  ;;  %v872_v14 = vld [vmem:[%s1253_s2 + $0x80] sm:$0xff]  ;;  %v867_v17 = vld [vmem:[%s1253_s2 + $0x58] sm:$0xff]  ;;  %v866_v20 = vld [vmem:[%s1253_s2 + $0x50] sm:$0xff]  ;;  %vm388_vm3 = vcmask 1043456   ;;  %s947_s16 = smov 16   ;;  %vm384_vm4 = vcmask 64512  }
   0xc   :  { %267 = vmatpush.bf16.msra.mxu2 %v873_v9  ;;  %v857_v21 = vld [vmem:[%s1253_s2 + $0x8] sm:$0xff]  ;;  %v856_v23 = vld [vmem:[%s1253_s2] sm:$0xff]  ;;  %v879_v29 = vld [vmem:[%s1255_s4 + $0x18] sm:$0xff] }
   0xd   :  { %v865_v22 = vld [vmem:[%s1253_s2 + $0x48] sm:$0xff]  ;;  %v864_v24 = vld [vmem:[%s1253_s2 + $0x40] sm:$0xff]  ;;  %328 = vmatpush.bf16.msra.mxu3 %v879_v29  ;;  %v878_v30 = vld [vmem:[%s1255_s4 + $0x10] sm:$0xff] }
   0xe   :  { %238 = vmatpush.bf16.msra.mxu0 %v860_v12  ;;  %v58_v25 = vld.sshfl [vmem:[#allocation1] sm:$0xff pattern:$0x75316420]  ;;  %v59_v26 = vld.sshfl [vmem:[#allocation1 + $0x8] sm:$0xff pattern:$0x75316420] }
   0xf   :  { %251 = vmatpush.bf16.msra.mxu1 %v868_v13  ;;  %v64_v27 = vpack.c.bf16 %v58_v25, %v58_v25  ;;  %v65_v28 = vpack.c.bf16 %v59_v26, %v59_v26  ;;  %v877_v31 = vld [vmem:[%s1255_s4 + $0x8] sm:$0xff]  ;;  %v876_v32 = vld [vmem:[%s1255_s4] sm:$0xff]  ;;  %v842_v9 = vld [vmem:[%s1263_s12 + $0x6c] sm:$0xf0] }
  0x10   :  { %268 = vmatpush.bf16.msra.mxu2 %v872_v14  ;;  %v881_v33 = vld [vmem:[%s1257_s6] sm:$0xff]  ;;  %v896_v6 = vld [vmem:[%s1263_s12 + $0x68] sm:$0xf0]  ;;  %v848_v10 = vld [vmem:[%s1263_s12 + $0x68] sm:$0xf] }
  0x11   :  { %329 = vmatpush.bf16.msra.mxu3 %v878_v30  ;;  %v901_v35 = vld [vmem:[%s1254_s3] ss:$0 sm:$0xff]  ;;  %v895_v7 = vld [vmem:[%s1263_s12 + $0x64] sm:$0xf]  ;;  %v897_v11 = vld [vmem:[%s1263_s12 + $0x70] sm:$0xf0] }
  0x12   :  { %239 = vmatpush.bf16.msra.mxu0 %v859_v16  ;;  %v902_v46 = vld [vmem:[%s1256_s5] ss:$0 sm:$0xff]  ;;  %s946_s5 = smov 120   ;;  %v845_v12 = vor.u32 %v895_v7, %v842_v9  ;;  %v849_v13 = vor.u32 %v897_v11, %v848_v10  ;;  %v828_v14 = vld [vmem:[%s1263_s12 + $0x48] sm:$0xf]  ;;  %s666_s3 = sshll.u32 %s1266_s15, 4  ;;  %s667_s3 = int_to_ptr.hbm [resolvable:$true] %s666_s3 }
  0x13   :  { %252 = vmatpush.bf16.msra.mxu1 %v867_v17  ;;  %757 = vmatmul.msk.bf16.vlgmr.msra.gmra.mxu2 %vm231_vm0, %v66_v18  ;;  %v379_v52 = vld [vmem:[%s1259_s8] sm:$0xf]  ;;  %v893_v15 = vld [vmem:[%s1263_s12 + $0x50] sm:$0xf0]  ;;  %v892_v16 = vld [vmem:[%s1263_s12 + $0x4c] sm:$0xf] }
  0x14   :  { %362 = vmatpush.bf16.msrb.mxu2 %v881_v33  ;;  %v390_v53 = vsel %vm388_vm3, %v379_v52, 0  ;;  %v903_v54 = vld [vmem:[%s1258_s7] ss:$0 sm:$0xff]  ;;  %v829_v17 = vor.u32 %v893_v15, %v828_v14  ;;  %v830_v18 = vld [vmem:[%s1263_s12 + $0x54] sm:$0xf0] }
  0x15   :  { %330 = vmatpush.bf16.msra.mxu3 %v877_v31  ;;  %v882_v61 = vld [vmem:[%s1261_s10] sm:$0xff]  ;;  %v889_v25 = vld [vmem:[%s1263_s12 + $0x34] sm:$0xf]  ;;  %v800_v52 = vld [vmem:[%s1263_s12 + $0x8] sm:$0xf] }
  0x16   :  { %240 = vmatpush.bf16.msra.mxu0 %v858_v19  ;;  %v368_v62 = vld [vmem:[%s1252_s1] sm:$0xf]  ;;  %v836_v19 = vld [vmem:[%s1263_s12 + $0x50] sm:$0xf] }
  0x17   :  { %253 = vmatpush.bf16.msra.mxu1 %v866_v20  ;;  %v840_v5 = vld [vmem:[%s1263_s12 + $0x60] sm:$0xf]  ;;  %v894_v20 = vld [vmem:[%s1263_s12 + $0x58] sm:$0xf0] }
  0x18   :  { %v841_v8 = vor.u32 %v896_v6, %v840_v5  ;;  %564 = vmatpush.bf16.msra.mxu2 %v845_v12  ;;  %v818_v26 = vld [vmem:[%s1263_s12 + $0x3c] sm:$0xf0] }
  0x19   :  { %331 = vmatpush.bf16.msra.mxu3 %v876_v32  ;;  %v821_v30 = vor.u32 %v889_v25, %v818_v26  ;;  %v904_v32 = vld [vmem:[%s1260_s9] ss:$0 sm:$0xff] }
  0x1a   :  { %241 = vmatpush.bf16.msra.mxu0 %v857_v21  ;;  %v833_v21 = vor.u32 %v892_v16, %v830_v18 }
  0x1b   :  { %254 = vmatpush.bf16.msra.mxu1 %v865_v22  ;;  %v837_v22 = vor.u32 %v894_v20, %v836_v19 }
  0x1c   :  { %565 = vmatpush.bf16.msra.mxu2 %v833_v21 }
  0x1d   :  { %399 = vmatpush.bf16.msrb.mxu3 %v390_v53  ;;  %v885_v53 = vld [vmem:[%s1263_s12 + $0x10] sm:$0xf0] }
  0x1e   :  { %242 = vmatpush.bf16.msra.mxu0 %v856_v23  ;;  %v816_v23 = vld [vmem:[%s1263_s12 + $0x30] sm:$0xf] }
  0x1f   :  { %255 = vmatpush.bf16.msra.mxu1 %v864_v24  ;;  %v890_v24 = vld [vmem:[%s1263_s12 + $0x38] sm:$0xf0] }
  0x20   :  { %v817_v29 = vor.u32 %v890_v24, %v816_v23  ;;  %566 = vmatpush.bf16.msra.mxu2 %v821_v30 }
  0x21   :  { %243 = vmatmul.bf16.vlgmr.msra.gmra.mxu0 %v64_v27  ;;  %v824_v27 = vld [vmem:[%s1263_s12 + $0x38] sm:$0xf] }
  0x22   :  { %256 = vmatmul.bf16.vlgmr.msra.gmra.mxu1 %v65_v28  ;;  %429 = vmatpush.bf16.msrb.mxu0 %v882_v61  ;;  %v891_v28 = vld [vmem:[%s1263_s12 + $0x40] sm:$0xf0] }
  0x23   :  { %551 = vmatpush.bf16.msrb.mxu1 %v841_v8  ;;  %v825_v31 = vor.u32 %v891_v28, %v824_v27 }
  0x27   :  { %552 = vmatpush.bf16.msrb.mxu1 %v829_v17 }
  0x2b   :  { %553 = vmatpush.bf16.msrb.mxu1 %v817_v29 }
  0x96   :  { %v270_v34 = vpop.f32.mrf.mxu2 }
  0x9e   :  { %v244_v36 = vpop.f32.mrf.mxu0  ;;  %v272_v39 = vpop.f32.mrf.mxu2 }
  0x9f   :  { %v257_v37 = vpop.f32.mrf.mxu1  ;;  %v245_v38 = vadd.f32 %v901_v35, %v244_v36  ;;  %v887_v39 = vld [vmem:[%s1263_s12 + $0x20] sm:$0xf0] }
  0xa1   :  { %v258_v40 = vadd.f32 %v257_v37, %v245_v38  ;;  %v804_v38 = vld [vmem:[%s1263_s12 + $0x18] sm:$0xf] }
  0xa3   :  { %v271_v41 = vadd.f32 %v270_v34, %v258_v40  ;;  %v886_v40 = vld [vmem:[%s1263_s12 + $0x1c] sm:$0xf] }
  0xa5   :  { %v274_v42 = vmax.f32 %v271_v41, 0.0  ;;  %v805_v41 = vor.u32 %v887_v39, %v804_v38 }
  0xa6   :  { %v246_v43 = vpop.f32.mrf.mxu0 }
  0xa7   :  { %v259_v44 = vpop.f32.mrf.mxu1  ;;  %v275_v45 = vpack.c.bf16 %v274_v42, %v274_v42  ;;  %v806_v42 = vld [vmem:[%s1263_s12 + $0x24] sm:$0xf0]  ;;  %v812_v43 = vld [vmem:[%s1263_s12 + $0x20] sm:$0xf]  ;;  %554 = vmatpush.bf16.msrb.mxu1 %v805_v41 }
  0xa8   :  { %v888_v44 = vld [vmem:[%s1263_s12 + $0x28] sm:$0xf0] }
  0xa9   :  { %778 = vmatmul.msk.bf16.vlgmr.msra.gmra.mxu3 %vm320_vm1, %v275_v45  ;;  %v809_v45 = vor.u32 %v886_v40, %v806_v42 }
  0xaa   :  { %577 = vmatpush.bf16.msra.mxu3 %v849_v13 }
  0xab   :  { %567 = vmatpush.bf16.msra.mxu2 %v809_v45 }
  0xae   :  { %578 = vmatpush.bf16.msra.mxu3 %v837_v22 }
  0xb2   :  { %579 = vmatpush.bf16.msra.mxu3 %v825_v31 }
 0x12c   :  { %v333_v47 = vpop.f32.mrf.mxu3 }
 0x12d   :  { %v334_v48 = vadd.f32 %v902_v46, %v333_v47  ;;  %v813_v46 = vor.u32 %v888_v44, %v812_v43  ;;  %v792_v47 = vld [vmem:[%s1263_s12] sm:$0xf] }
 0x12f   :  { %v337_v49 = vmax.f32 %v334_v48, 0.0  ;;  %580 = vmatpush.bf16.msra.mxu3 %v813_v46  ;;  %v884_v48 = vld [vmem:[%s1263_s12 + $0x8] sm:$0xf0] }
 0x131   :  { %v338_v50 = vpack.c.bf16 %v337_v49, %v337_v49 }
 0x133   :  { %783 = vmatmul.msk.bf16.vlgmr.msrb.gmra.mxu2 %vm351_vm2, %v338_v50  ;;  %v793_v50 = vor.u32 %v884_v48, %v792_v47 }
 0x134   :  { %v335_v51 = vpop.f32.mrf.mxu3 }
 0x135   :  { %v794_v51 = vld [vmem:[%s1263_s12 + $0xc] sm:$0xf0]  ;;  %555 = vmatpush.bf16.msrb.mxu1 %v793_v50 }
 0x1b6   :  { %v364_v55 = vpop.f32.mrf.mxu2 }
 0x1b7   :  { %v365_v56 = vadd.f32 %v903_v54, %v364_v55  ;;  %v801_v55 = vor.u32 %v885_v53, %v800_v52 }
 0x1b9   :  { %v369_v57 = vmul.f32 0.5, %v365_v56  ;;  %581 = vmatpush.bf16.msra.mxu3 %v801_v55 }
 0x1bb   :  { %v370_v58 = vmul.f32 1.442695, %v369_v57 }
 0x1bd   :  { %906 = vpow2.f32 %v370_v58 }
 0x1be   :  { %v366_v59 = vpop.f32.mrf.mxu2 }
 0x1c3   :  { %v907_v60 = vpop.eup %906 }
 0x1c4   :  { %373 = vrot.lane.b32.xlu0 %v907_v60, %s946_s5 }
 0x1cc   :  { %588 = vrot.lane.b32.xlu0 %v365_v56, %s947_s16 }
 0x236   :  { %v374_v63 = vpop.permute.xlu0 %373 }
 0x237   :  { %v376_v0 = vmul.f32 %v374_v63, %v368_v62  ;;  %v457_v62 = vld [vmem:[%s1264_s13] sm:$0x7] }
 0x238   :  { %v459_v63 = vperm.slane %v457_v62, 0 }
 0x239   :  { %v377_v1 = vadd.f32 %v376_v0, %v365_v56  ;;  %v905_v56 = vld [vmem:[%s1262_s11] ss:$0 sm:$0xff]  ;;  %s948_s11 = smov [#allocation2]  }
 0x23a   :  { %s664_s13 = sshll.u32 %s948_s11, 4  ;;  %s665_s13 = int_to_ptr.vmem [resolvable:$true] %s664_s13 }
 0x23b   :  { %v378_v2 = vpack.c.bf16 %v377_v1, %v377_v1 }
 0x23d   :  { %784 = vmatmul.msk.bf16.vlgmr.msrb.gmra.mxu3 %vm384_vm4, %v378_v2 }
 0x23e   :  { %v589_v3 = vpop.permute.xlu0 %588 }
 0x23f   :  { %v591_v4 = vsel %vm351_vm2, %v337_v49, %v589_v3  ;;  %v883_v49 = vld [vmem:[%s1263_s12 + $0x4] sm:$0xf]  ;;  %v460_v3 = vperm.slane %v457_v62, 1 }
 0x240   :  { %592 = vst [vmem:[%s1265_s14] sm:$0xf] %v591_v4  ;;  %v797_v54 = vor.u32 %v883_v49, %v794_v51  ;;  %v461_v4 = vperm.slane %v457_v62, 2 }
 0x242   :  { %568 = vmatpush.bf16.msra.mxu2 %v797_v54 }
 0x2c0   :  { %v401_v33 = vpop.f32.mrf.mxu3 }
 0x2c1   :  { %v402_v34 = vadd.f32 %v904_v32, %v401_v33 }
 0x2c3   :  { %v405_v35 = vmax.f32 %v402_v34, 0.0 }
 0x2c5   :  { %v406_v36 = vpack.c.bf16 %v405_v35, %v405_v35 }
 0x2c7   :  { %789 = vmatmul.msk.bf16.vlgmr.msrb.gmra.mxu0 %vm351_vm2, %v406_v36 }
 0x2c8   :  { %v403_v37 = vpop.f32.mrf.mxu3 }
 0x344   :  { %v431_v57 = vpop.f32.mrf.mxu0 }
 0x345   :  { %v432_v58 = vadd.f32 %v905_v56, %v431_v57 }
 0x347   :  { %v435_v59 = vmax.f32 %v432_v58, 0.0 }
 0x349   :  { %v436_v60 = vpack.c.bf16 %v435_v59, %v435_v59 }
 0x34b   :  { %850 = vmatmul.msk.bf16.vlgmr.msrb.gmra.mxu1 %vm320_vm1, %v436_v60  ;;  %851 = vmatmul.msk.bf16.vlgmr.msra.gmra.mxu2 %vm320_vm1, %v436_v60 }
 0x34c   :  { %852 = vmatmul.msk.bf16.vlgmr.msra.gmra.mxu3 %vm320_vm1, %v436_v60  ;;  %v433_v61 = vpop.f32.mrf.mxu0 }
 0x3c8   :  { %v557_v0 = vpop.f32.mrf.mxu1 }
 0x3c9   :  { %v558_v1 = vadd.f32 %v557_v0, %v459_v63 }
 0x3cb   :  { %v853_v2 = vmul.f32 -1.442695, %v558_v1 }
 0x3cd   :  { %908 = vpow2.f32 %v853_v2 }
 0x3ce   :  { %v570_v5 = vpop.f32.mrf.mxu2 }
 0x3cf   :  { %v571_v6 = vadd.f32 %v570_v5, %v460_v3  ;;  %v583_v7 = vpop.f32.mrf.mxu3 }
 0x3d0   :  { %v584_v8 = vadd.f32 %v583_v7, %v461_v4  ;;  %v559_v9 = vpop.f32.mrf.mxu1 }
 0x3d1   :  { %v854_v10 = vmul.f32 -1.442695, %v571_v6 }
 0x3d2   :  { %v855_v11 = vmul.f32 -1.442695, %v584_v8 }
 0x3d3   :  { %v909_v12 = vpop.eup %908  ;;  %910 = vpow2.f32 %v854_v10 }
 0x3d4   :  { %v602_v13 = vadd.f32 1.0, %v909_v12  ;;  %912 = vpow2.f32 %v855_v11 }
 0x3d6   :  { %914 = vrcp.f32 %v602_v13  ;;  %v572_v14 = vpop.f32.mrf.mxu2  ;;  %vm610_vm5 = vweird.f32 %v602_v13  ;;  %v616_v35 = vand.u32 2147483648, %v602_v13  ;;  %v614_v39 = vand.u32 2147483647, %v602_v13 }
 0x3d7   :  { %v585_v15 = vpop.f32.mrf.mxu3 }
 0x3d8   :  { %v617_v46 = vor.u32 1.1754944e-38, %v616_v35  ;;  %vm615_vm0 = vcmp.eq.f32.partialorder %v614_v39, 8.507059e+37 }
 0x3d9   :  { %v911_v16 = vpop.eup %910 }
 0x3da   :  { %v913_v17 = vpop.eup %912  ;;  %v603_v18 = vadd.f32 1.0, %v911_v16 }
 0x3db   :  { %v604_v19 = vadd.f32 1.0, %v913_v17 }
 0x3dc   :  { %v915_v20 = vpop.eup %914  ;;  %916 = vrcp.f32 %v603_v18  ;;  %v629_v30 = vand.u32 2147483647, %v603_v18  ;;  %v631_v31 = vand.u32 2147483648, %v603_v18  ;;  %vm625_vm9 = vweird.f32 %v603_v18 }
 0x3dd   :  { %v606_v21 = vmul.f32 %v915_v20, %v602_v13  ;;  %918 = vrcp.f32 %v604_v19  ;;  %vm611_vm6 = vweird.f32 %v915_v20  ;;  %v646_v34 = vand.u32 2147483648, %v604_v19 }
 0x3de   :  { %v644_v37 = vand.u32 2147483647, %v604_v19  ;;  %vm1241_vm10 = vmor %vm610_vm5, %vm611_vm6  ;;  %v632_v41 = vor.u32 1.1754944e-38, %v631_v31  ;;  %vm640_vm12 = vweird.f32 %v604_v19  ;;  %vm630_vm13 = vcmp.eq.f32.partialorder %v629_v30, 8.507059e+37 }
 0x3df   :  { %v607_v22 = vsub.f32 1.0, %v606_v21  ;;  %v647_v45 = vor.u32 1.1754944e-38, %v646_v34 }
 0x3e0   :  { %vm645_vm15 = vcmp.eq.f32.partialorder %v644_v37, 8.507059e+37 }
 0x3e1   :  { %v608_v26 = vmul.f32 %v915_v20, %v607_v22 }
 0x3e2   :  { %v917_v23 = vpop.eup %916 }
 0x3e3   :  { %v919_v24 = vpop.eup %918  ;;  %v621_v25 = vmul.f32 %v917_v23, %v603_v18  ;;  %v609_v33 = vadd.f32 %v915_v20, %v608_v26  ;;  %vm626_vm7 = vweird.f32 %v917_v23 }
 0x3e4   :  { %v636_v27 = vmul.f32 %v919_v24, %v604_v19  ;;  %vm641_vm8 = vweird.f32 %v919_v24  ;;  %vm627_vm11 = vmor %vm625_vm9, %vm626_vm7 }
 0x3e5   :  { %v622_v28 = vsub.f32 1.0, %v621_v25  ;;  %v613_v43 = vsel %vm1241_vm10, %v915_v20, %v609_v33  ;;  %vm642_vm14 = vmor %vm640_vm12, %vm641_vm8 }
 0x3e6   :  { %v637_v29 = vsub.f32 1.0, %v636_v27  ;;  %v618_v51 = vsel %vm615_vm0, %v617_v46, %v613_v43 }
 0x3e7   :  { %v623_v32 = vmul.f32 %v917_v23, %v622_v28 }
 0x3e8   :  { %v638_v36 = vmul.f32 %v919_v24, %v637_v29 }
 0x3e9   :  { %v624_v40 = vadd.f32 %v917_v23, %v623_v32 }
 0x3ea   :  { %v639_v42 = vadd.f32 %v919_v24, %v638_v36 }
 0x3eb   :  { %v628_v44 = vsel %vm627_vm11, %v917_v23, %v624_v40 }
 0x3ec   :  { %v633_v47 = vsel %vm630_vm13, %v632_v41, %v628_v44  ;;  %v643_v48 = vsel %vm642_vm14, %v919_v24, %v639_v42 }
 0x3ed   :  { %v648_v49 = vsel %vm645_vm15, %v647_v45, %v643_v48  ;;  %v652_v50 = vrot.slane %v633_v47, 4 }
 0x3ee   :  { %656 = vst [vmem:[#allocation2 + $0x8] sm:$0xf] %v648_v49 }
 0x3ef   :  { %v653_v52 = vsel %vm388_vm3, %v618_v51, %v652_v50 }
 0x3f0   :  { %655 = vst [vmem:[#allocation2] sm:$0xff] %v653_v52 }
 0x3f1   :  { %669 = dma.vmem_to_hbm [thread:$0]  %s665_s13, 192, %s667_s3, [#allocation3]  }
 0x3f2   :  { %944 = dma.done.wait [#allocation3], 192  }
 0x3f3   :  { %945 = vsyncadd [#allocation3], 4294967104 }
 0x3f4   :  { %676 = vsyncpa [#allocation3], 1 }

</bundles_post_ra>
